<compile_context>
chip_gen: v5e
topology: v5e:2x2
jax: 0.10.0
libtpu: 0.0.40
codegen_flags: <defaults>
</compile_context>

<pallas_src>
import functools

import jax
import jax.numpy as jnp
from jax.experimental import pallas as pl
from jax.experimental.pallas import tpu as pltpu


def _round_up(x, m):
    return (x + m - 1) // m * m


# ---------------------------------------------------------------------------
# Kernel 1: per-row-tile feature projections (runs once per layer).
# ---------------------------------------------------------------------------
def _project_kernel(*refs, separate_skip):
    if separate_skip:
        (x_ref, wl_ref, wr_ref, b_ref, ws_ref, bs_ref,
         p_ref, r_ref, s_ref) = refs
    else:
        x_ref, wl_ref, wr_ref, b_ref, p_ref, r_ref = refs

    x = x_ref[...]
    # P feeds the N^2 aggregation matmul -> store in bf16.
    p_ref[...] = jnp.dot(x, wl_ref[...],
                         preferred_element_type=jnp.float32).astype(p_ref.dtype)
    r_ref[...] = (jnp.dot(x, wr_ref[...], preferred_element_type=jnp.float32)
                  + b_ref[...])
    if separate_skip:
        s_ref[...] = (jnp.dot(x, ws_ref[...],
                              preferred_element_type=jnp.float32) + bs_ref[...])


# ---------------------------------------------------------------------------
# Kernel 2: tiled mean-aggregation + combine.
#   grid = (row tiles, K tiles); K is the reduction axis (last, 'arbitrary').
# ---------------------------------------------------------------------------
def _aggregate_kernel(*refs, normalize, apply_elu, separate_skip):
    if separate_skip:
        a_ref, p_ref, r_ref, s_ref, o_ref, acc_ref = refs
    else:
        a_ref, p_ref, r_ref, o_ref, acc_ref = refs
        s_ref = None

    k = pl.program_id(1)

    @pl.when(k == 0)
    def _():
        acc_ref[...] = jnp.zeros_like(acc_ref)

    # bf16 x bf16 -> f32 accumulation on the MXU.
    acc_ref[...] += jnp.dot(a_ref[...], p_ref[...],
                            preferred_element_type=jnp.float32)

    @pl.when(k == pl.num_programs(1) - 1)
    def _():
        h = acc_ref[...] + r_ref[...]
        if normalize:
            # F.normalize(h, p=2, dim=-1): h / max(||h||, 1e-12).
            # rsqrt goes to the EUP (own VLIW slot) instead of a VALU divide.
            sumsq = jnp.sum(h * h, axis=-1, keepdims=True)
            h = h * jax.lax.rsqrt(jnp.maximum(sumsq, 1e-24))
        if s_ref is not None:
            h = h + s_ref[...]
        if apply_elu:
            # ELU(alpha=1); expm1(min(z,0)) avoids overflow on the dead branch
            # and keeps precision near zero.
            h = jnp.where(h > 0.0, h, jnp.expm1(jnp.minimum(h, 0.0)))
        o_ref[...] = h.astype(o_ref.dtype)


def _choose_k_tile(n_pad, d_out_pad, tm=128, budget_bytes=12 * 1024 * 1024):
    """Largest K tile (multiple of 128 dividing n_pad) whose double-buffered
    footprint stays under a conservative scoped-VMEM budget that is safe on
    v5e (16 MiB default scoped), v6e (32 MiB) and v7x (64 MiB physical)."""
    for tk in (2048, 1024, 512, 256, 128):
        if n_pad % tk != 0:
            continue
        a_bytes = 2 * tm * tk * 2                 # bf16 A tile, double-buffered
        p_bytes = 2 * tk * d_out_pad * 2          # bf16 P tile, double-buffered
        side = 7 * tm * d_out_pad * 4             # R, S, out (2x each) + acc
        if a_bytes + p_bytes + side <= budget_bytes:
            return tk
    return 128


def _sage_layer(a_bf16, x, wl, wr, b, ws, bs, *,
                normalize, apply_elu, separate_skip):
    n_pad, f_in = x.shape
    d_out = wl.shape[1]

    # ------------------------- projection pass -------------------------
    tm_p = 128
    w_spec = pl.BlockSpec((f_in, d_out), lambda i: (0, 0))
    b_spec = pl.BlockSpec((1, d_out), lambda i: (0, 0))
    row_spec = pl.BlockSpec((tm_p, d_out), lambda i: (i, 0))

    in_specs = [pl.BlockSpec((tm_p, f_in), lambda i: (i, 0)),
                w_spec, w_spec, b_spec]
    args = [x, wl, wr, b]
    out_shapes = [jax.ShapeDtypeStruct((n_pad, d_out), jnp.bfloat16),
                  jax.ShapeDtypeStruct((n_pad, d_out), jnp.float32)]
    out_specs = [row_spec, row_spec]
    if separate_skip:
        in_specs += [w_spec, b_spec]
        args += [ws, bs]
        out_shapes.append(jax.ShapeDtypeStruct((n_pad, d_out), jnp.float32))
        out_specs.append(row_spec)

    proj = pl.pallas_call(
        functools.partial(_project_kernel, separate_skip=separate_skip),
        grid_spec=pltpu.PrefetchScalarGridSpec(
            num_scalar_prefetch=0,
            grid=(n_pad // tm_p,),
            in_specs=in_specs,
            out_specs=tuple(out_specs)),
        out_shape=tuple(out_shapes),
        compiler_params=pltpu.CompilerParams(
            dimension_semantics=("parallel",)),
    )(*args)

    if separate_skip:
        p_mat, r_mat, s_mat = proj
    else:
        p_mat, r_mat = proj
        s_mat = None

    # -------------------- tiled aggregation + combine -------------------
    tm = 128
    tk = _choose_k_tile(n_pad, d_out, tm=tm)

    agg_args = [a_bf16, p_mat, r_mat]
    agg_in_specs = [
        pl.BlockSpec((tm, tk), lambda i, k: (i, k)),
        pl.BlockSpec((tk, d_out), lambda i, k: (k, 0)),
        pl.BlockSpec((tm, d_out), lambda i, k: (i, 0)),
    ]
    if separate_skip:
        agg_args.append(s_mat)
        agg_in_specs.append(pl.BlockSpec((tm, d_out), lambda i, k: (i, 0)))

    out = pl.pallas_call(
        functools.partial(_aggregate_kernel, normalize=normalize,
                          apply_elu=apply_elu, separate_skip=separate_skip),
        grid_spec=pltpu.PrefetchScalarGridSpec(
            num_scalar_prefetch=0,
            grid=(n_pad // tm, n_pad // tk),
            in_specs=agg_in_specs,
            out_specs=pl.BlockSpec((tm, d_out), lambda i, k: (i, 0)),
            scratch_shapes=[pltpu.VMEM((tm, d_out), jnp.float32)]),
        out_shape=jax.ShapeDtypeStruct((n_pad, d_out), jnp.float32),
        compiler_params=pltpu.CompilerParams(
            dimension_semantics=("parallel", "arbitrary")),
    )(*agg_args)
    return out


def graphsage_ppi_forward(A, x, params, *, normalize):
    n, f_in = x.shape
    hidden = params["w1l"].shape[1]
    classes = params["w2l"].shape[1]

    n_pad = _round_up(n, 128)
    f_pad = _round_up(f_in, 128)
    h_pad = _round_up(hidden, 128)
    c_pad = _round_up(classes, 128)

    def pad2(a, rows, cols):
        out = jnp.zeros((rows, cols), jnp.float32)
        return out.at[:a.shape[0], :a.shape[1]].set(a.astype(jnp.float32))

    # bf16 adjacency: dominant byte/FLOP term (halves HBM traffic & VMEM).
    a_bf16 = pad2(A, n_pad, n_pad).astype(jnp.bfloat16)
    x_p = pad2(x, n_pad, f_pad)

    w1l = pad2(params["w1l"], f_pad, h_pad)
    w1r = pad2(params["w1r"], f_pad, h_pad)
    b1 = pad2(params["b1"], 1, h_pad)
    wl1 = pad2(params["wlin1"], f_pad, h_pad)
    bl1 = pad2(params["blin1"], 1, h_pad)

    w2l = pad2(params["w2l"], h_pad, c_pad)
    w2r = pad2(params["w2r"], h_pad, c_pad)
    b2 = pad2(params["b2"], 1, c_pad)
    wl2 = pad2(params["wlin2"], h_pad, c_pad)
    bl2 = pad2(params["blin2"], 1, c_pad)

    separate_skip = bool(normalize)
    if not separate_skip:
        # No L2-normalize between the terms: fold the skip Linear into lin_r
        # (saves one N x F x D matmul per layer).
        w1r, b1 = w1r + wl1, b1 + bl1
        w2r, b2 = w2r + wl2, b2 + bl2
        wl1 = bl1 = wl2 = bl2 = None

    x1 = _sage_layer(a_bf16, x_p, w1l, w1r, b1, wl1, bl1,
                     normalize=normalize, apply_elu=True,
                     separate_skip=separate_skip)
    out = _sage_layer(a_bf16, x1, w2l, w2r, b2, wl2, bl2,
                      normalize=normalize, apply_elu=False,
                      separate_skip=separate_skip)
    return out[:n, :classes]


def build_mean_adjacency(edge_index, num_nodes):
    """Dense row-normalized adjacency: A[i, j] = 1/deg_in(i) if edge j->i."""
    # TODO(synk): replace the dense N x N adjacency with a CSR +
    # PrefetchScalarGridSpec neighbor-gather kernel for large PPI graphs.
    src, dst = edge_index[0], edge_index[1]
    A = jnp.zeros((num_nodes, num_nodes), jnp.float32).at[dst, src].add(1.0)
    deg = jnp.sum(A, axis=1, keepdims=True)
    return jnp.where(deg > 0, A / jnp.maximum(deg, 1.0), 0.0)


def init_params(key, input_dim, hidden_dim, num_classes):
    ks = jax.random.split(key, 10)
    u = lambda k, shape, fan_in: jax.random.uniform(
        k, shape, jnp.float32, -1.0 / jnp.sqrt(fan_in), 1.0 / jnp.sqrt(fan_in))
    # Weights stored transposed vs. PyTorch Linear (shape = (in, out)).
    return {
        # SAGEConv 1: lin_l (with bias), lin_r (no bias)
        "w1l": u(ks[0], (input_dim, hidden_dim), input_dim),
        "w1r": u(ks[1], (input_dim, hidden_dim), input_dim),
        "b1":  u(ks[2], (1, hidden_dim), input_dim),
        # Linear 1
        "wlin1": u(ks[3], (input_dim, hidden_dim), input_dim),
        "blin1": u(ks[4], (1, hidden_dim), input_dim),
        # SAGEConv 2
        "w2l": u(ks[5], (hidden_dim, num_classes), hidden_dim),
        "w2r": u(ks[6], (hidden_dim, num_classes), hidden_dim),
        "b2":  u(ks[7], (1, num_classes), hidden_dim),
        # Linear 2
        "wlin2": u(ks[8], (hidden_dim, num_classes), hidden_dim),
        "blin2": u(ks[9], (1, num_classes), hidden_dim),
    }


def reference_forward(A, x, params, *, normalize):
    """Pure-JAX f32 reference of the PyTorch module (for tolerance check)."""
    def l2n(h):
        return h / jnp.maximum(
            jnp.sqrt(jnp.sum(h * h, axis=-1, keepdims=True)), 1e-12)

    def sage(h, wl, wr, b, ws, bs):
        conv = (A @ h) @ wl + b + h @ wr
        if normalize:
            conv = l2n(conv)
        return conv + (h @ ws + bs)

    h1 = sage(x, params["w1l"], params["w1r"], params["b1"],
              params["wlin1"], params["blin1"])
    h1 = jnp.where(h1 > 0.0, h1, jnp.expm1(jnp.minimum(h1, 0.0)))  # ELU
    return sage(h1, params["w2l"], params["w2r"], params["b2"],
                params["wlin2"], params["blin2"])


if __name__ == "__main__":
    N, INPUT_DIM, HIDDEN_DIM, NUM_CLASSES = 8, 16, 32, 8

    key = jax.random.PRNGKey(0)
    kx, kp = jax.random.split(key)

    x = jax.random.normal(kx, (N, INPUT_DIM), jnp.float32)

    # Deterministic small graph: ring both directions + a couple of chords.
    src = jnp.array([0, 1, 2, 3, 4, 5, 6, 7, 1, 2, 3, 4, 5, 6, 7, 0, 0, 3],
                    jnp.int32)
    dst = jnp.array([1, 2, 3, 4, 5, 6, 7, 0, 0, 1, 2, 3, 4, 5, 6, 7, 4, 7],
                    jnp.int32)
    edge_index = jnp.stack([src, dst])

    A = build_mean_adjacency(edge_index, N)
    params = init_params(kp, INPUT_DIM, HIDDEN_DIM, NUM_CLASSES)

    # normalize=True exercises the separate-skip path; normalize=False
    # exercises the folded lin_r+skip path.
    for norm in (True, False):
        out = graphsage_ppi_forward(A, x, params, normalize=norm)
        jax.block_until_ready(out)
        assert out.shape == (N, NUM_CLASSES) and out.dtype == jnp.float32
        ref = reference_forward(A, x, params, normalize=norm)
        err = float(jnp.max(jnp.abs(out - ref)))
        assert bool(jnp.all(jnp.isfinite(out))) and err < 5e-2, \
            f"normalize={norm}: max |err| = {err}"

    print("KERNEL_OK")
</pallas_src>

<mosaic_0001>
module attributes {stable_mosaic.version = 11 : i64} {
  func.func @_project_kernel(%arg0: i32, %arg1: memref<128x128xf32, #tpu.memory_space<vmem>>, %arg2: memref<128x128xf32, #tpu.memory_space<vmem>>, %arg3: memref<128x128xf32, #tpu.memory_space<vmem>>, %arg4: memref<1x128xf32, #tpu.memory_space<vmem>>, %arg5: memref<128x128xf32, #tpu.memory_space<vmem>>, %arg6: memref<1x128xf32, #tpu.memory_space<vmem>>, %arg7: memref<128x128xbf16, #tpu.memory_space<vmem>>, %arg8: memref<128x128xf32, #tpu.memory_space<vmem>>, %arg9: memref<128x128xf32, #tpu.memory_space<vmem>>) attributes {dimension_semantics = [#tpu.dimension_semantics<parallel>], iteration_bounds = array<i64: 1>, scalar_prefetch = 0 : i64, scratch_operands = 0 : i64, tpu.core_type = #tpu.core_type<tc>, window_params = [{transform_indices = @transform_0, window_bounds = array<i64: 128, 128>}, {pipeline_mode = #tpu.pipeline_mode<synchronous>, transform_indices = @transform_1, window_bounds = array<i64: 128, 128>}, {pipeline_mode = #tpu.pipeline_mode<synchronous>, transform_indices = @transform_2, window_bounds = array<i64: 128, 128>}, {pipeline_mode = #tpu.pipeline_mode<synchronous>, transform_indices = @transform_3, window_bounds = array<i64: 1, 128>}, {pipeline_mode = #tpu.pipeline_mode<synchronous>, transform_indices = @transform_4, window_bounds = array<i64: 128, 128>}, {pipeline_mode = #tpu.pipeline_mode<synchronous>, transform_indices = @transform_5, window_bounds = array<i64: 1, 128>}, {transform_indices = @transform_6, window_bounds = array<i64: 128, 128>}, {transform_indices = @transform_7, window_bounds = array<i64: 128, 128>}, {transform_indices = @transform_8, window_bounds = array<i64: 128, 128>}]} {
    %c0 = arith.constant 0 : index
    %c0_0 = arith.constant 0 : index
    %0 = vector.load %arg1[%c0, %c0_0] : memref<128x128xf32, #tpu.memory_space<vmem>>, vector<128x128xf32>
    %c0_1 = arith.constant 0 : index
    %c0_2 = arith.constant 0 : index
    %1 = vector.load %arg2[%c0_1, %c0_2] : memref<128x128xf32, #tpu.memory_space<vmem>>, vector<128x128xf32>
    %cst = arith.constant dense<0.000000e+00> : vector<128x128xf32>
    %2 = tpu.matmul %0, %1, %cst {dimension_numbers = #tpu.dot_dimension_numbers<[1], [0], [0], [1], [0, 0, 1, 1], [], []>} : vector<128x128xf32>, vector<128x128xf32>, vector<128x128xf32> -> vector<128x128xf32>
    %3 = arith.truncf %2 : vector<128x128xf32> to vector<128x128xbf16>
    %c0_3 = arith.constant 0 : index
    %c0_4 = arith.constant 0 : index
    %4 = vector.load %arg7[%c0_3, %c0_4] : memref<128x128xbf16, #tpu.memory_space<vmem>>, vector<128x128xbf16>
    tpu.vector_store %arg7[%c0_3, %c0_4], %3 {strides = array<i32>} : memref<128x128xbf16, #tpu.memory_space<vmem>>, vector<128x128xbf16>,
    %c0_5 = arith.constant 0 : index
    %c0_6 = arith.constant 0 : index
    %5 = vector.load %arg3[%c0_5, %c0_6] : memref<128x128xf32, #tpu.memory_space<vmem>>, vector<128x128xf32>
    %cst_7 = arith.constant dense<0.000000e+00> : vector<128x128xf32>
    %6 = tpu.matmul %0, %5, %cst_7 {dimension_numbers = #tpu.dot_dimension_numbers<[1], [0], [0], [1], [0, 0, 1, 1], [], []>} : vector<128x128xf32>, vector<128x128xf32>, vector<128x128xf32> -> vector<128x128xf32>
    %c0_8 = arith.constant 0 : index
    %c0_9 = arith.constant 0 : index
    %7 = vector.load %arg4[%c0_8, %c0_9] : memref<1x128xf32, #tpu.memory_space<vmem>>, vector<1x128xf32>
    %8 = vector.broadcast %7 : vector<1x128xf32> to vector<128x128xf32>
    %9 = arith.addf %6, %8 : vector<128x128xf32>
    %c0_10 = arith.constant 0 : index
    %c0_11 = arith.constant 0 : index
    %10 = vector.load %arg8[%c0_10, %c0_11] : memref<128x128xf32, #tpu.memory_space<vmem>>, vector<128x128xf32>
    tpu.vector_store %arg8[%c0_10, %c0_11], %9 {strides = array<i32>} : memref<128x128xf32, #tpu.memory_space<vmem>>, vector<128x128xf32>,
    %c0_12 = arith.constant 0 : index
    %c0_13 = arith.constant 0 : index
    %11 = vector.load %arg5[%c0_12, %c0_13] : memref<128x128xf32, #tpu.memory_space<vmem>>, vector<128x128xf32>
    %cst_14 = arith.constant dense<0.000000e+00> : vector<128x128xf32>
    %12 = tpu.matmul %0, %11, %cst_14 {dimension_numbers = #tpu.dot_dimension_numbers<[1], [0], [0], [1], [0, 0, 1, 1], [], []>} : vector<128x128xf32>, vector<128x128xf32>, vector<128x128xf32> -> vector<128x128xf32>
    %c0_15 = arith.constant 0 : index
    %c0_16 = arith.constant 0 : index
    %13 = vector.load %arg6[%c0_15, %c0_16] : memref<1x128xf32, #tpu.memory_space<vmem>>, vector<1x128xf32>
    %14 = vector.broadcast %13 : vector<1x128xf32> to vector<128x128xf32>
    %15 = arith.addf %12, %14 : vector<128x128xf32>
    %c0_17 = arith.constant 0 : index
    %c0_18 = arith.constant 0 : index
    %16 = vector.load %arg9[%c0_17, %c0_18] : memref<128x128xf32, #tpu.memory_space<vmem>>, vector<128x128xf32>
    tpu.vector_store %arg9[%c0_17, %c0_18], %15 {strides = array<i32>} : memref<128x128xf32, #tpu.memory_space<vmem>>, vector<128x128xf32>,
    return
  }
  func.func @transform_0(%arg0: i32) -> (i32, i32) {
    %c0_i32 = arith.constant 0 : i32
    %c0_i32_0 = arith.constant 0 : i32
    return %arg0, %c0_i32 : i32, i32
  }
  func.func @transform_1(%arg0: i32) -> (i32, i32) {
    %c0_i32 = arith.constant 0 : i32
    %c0_i32_0 = arith.constant 0 : i32
    %c0_i32_1 = arith.constant 0 : i32
    return %c0_i32, %c0_i32_0 : i32, i32
  }
  func.func @transform_2(%arg0: i32) -> (i32, i32) {
    %c0_i32 = arith.constant 0 : i32
    %c0_i32_0 = arith.constant 0 : i32
    %c0_i32_1 = arith.constant 0 : i32
    return %c0_i32, %c0_i32_0 : i32, i32
  }
  func.func @transform_3(%arg0: i32) -> (i32, i32) {
    %c0_i32 = arith.constant 0 : i32
    %c0_i32_0 = arith.constant 0 : i32
    %c0_i32_1 = arith.constant 0 : i32
    return %c0_i32, %c0_i32_0 : i32, i32
  }
  func.func @transform_4(%arg0: i32) -> (i32, i32) {
    %c0_i32 = arith.constant 0 : i32
    %c0_i32_0 = arith.constant 0 : i32
    %c0_i32_1 = arith.constant 0 : i32
    return %c0_i32, %c0_i32_0 : i32, i32
  }
  func.func @transform_5(%arg0: i32) -> (i32, i32) {
    %c0_i32 = arith.constant 0 : i32
    %c0_i32_0 = arith.constant 0 : i32
    %c0_i32_1 = arith.constant 0 : i32
    return %c0_i32, %c0_i32_0 : i32, i32
  }
  func.func @transform_6(%arg0: i32) -> (i32, i32) {
    %c0_i32 = arith.constant 0 : i32
    %c0_i32_0 = arith.constant 0 : i32
    return %arg0, %c0_i32 : i32, i32
  }
  func.func @transform_7(%arg0: i32) -> (i32, i32) {
    %c0_i32 = arith.constant 0 : i32
    %c0_i32_0 = arith.constant 0 : i32
    return %arg0, %c0_i32 : i32, i32
  }
  func.func @transform_8(%arg0: i32) -> (i32, i32) {
    %c0_i32 = arith.constant 0 : i32
    %c0_i32_0 = arith.constant 0 : i32
    return %arg0, %c0_i32 : i32, i32
  }
}

</mosaic_0001>

<bundles_post_ra>
// kernel: tpu_custom_call.1
= control target key start
LH: loop header
LB: loop body
LE: loop exit
PB: predicated region body
PF: predicated region fallthrough
CT: control target
= control target key end

     0   :  { %14 = vsyncpa [#allocation3], 0  ;;  %s1029_s0 = inlined_call_operand.hbm [shape: f32[128,128], index: 0, kind: input, shape index: {}]   ;;  %s1030_s1 = inlined_call_operand.hbm [shape: f32[128,128], index: 1, kind: input, shape index: {}]   ;;  %s1031_s2 = inlined_call_operand.hbm [shape: f32[128,128], index: 2, kind: input, shape index: {}]   ;;  %s1032_s3 = inlined_call_operand.vmem [shape: f32[1,128], index: 3, kind: input, shape index: {}]   ;;  %s1033_s4 = inlined_call_operand.hbm [shape: f32[128,128], index: 4, kind: input, shape index: {}]   ;;  %s1034_s5 = inlined_call_operand.vmem [shape: f32[1,128], index: 5, kind: input, shape index: {}]   ;;  %s1035_s6 = inlined_call_operand.hbm [shape: bf16[128,128], index: 6, kind: output, shape index: {0}]   ;;  %s1036_s7 = inlined_call_operand.hbm [shape: f32[128,128], index: 7, kind: output, shape index: {1}]   ;;  %s1037_s8 = inlined_call_operand.hbm [shape: f32[128,128], index: 8, kind: output, shape index: {2}]  }
   0x1   :  { %15 = vsyncpa [#allocation6], 0 }
   0x2   :  { %16 = vsyncpa [#allocation9], 0 }
   0x3   :  { %17 = vsyncpa [#allocation4], 0 }
   0x4   :  { %18 = vsyncpa [#allocation12], 0  ;;  %s36_s29 = sshll.u32 %s1030_s1, 4  ;;  %s764_s30 = smov [#allocation5]   ;;  %s37_s29 = int_to_ptr.hbm [resolvable:$true] %s36_s29 }
   0x5   :  { %s38_s9 = sshll.u32 %s764_s30, 4  ;;  %s23_s12 = sshll.u32 %s1029_s0, 4  ;;  %s39_s9 = int_to_ptr.vmem [resolvable:$true] %s38_s9  ;;  %s24_s12 = int_to_ptr.hbm [resolvable:$true] %s23_s12 }
   0x6   :  { %s765_s13 = smov 128   ;;  %s766_s14 = smov 8  }
   0x7   :  { %44 = dma.hbm_to_vmem [thread:$0]  %s37_s29, 2048, %s39_s9, [#allocation6], %s765_s13, %s765_s13, %s766_s14  }
   0x8   :  { %s767_s15 = smov [#allocation2]   ;;  %s49_s1 = sshll.u32 %s1031_s2, 4  ;;  %s50_s1 = int_to_ptr.hbm [resolvable:$true] %s49_s1 }
   0x9   :  { %s25_s16 = sshll.u32 %s767_s15, 4  ;;  %s64_s20 = sshll.u32 %s1033_s4, 4  ;;  %s26_s16 = int_to_ptr.vmem [resolvable:$true] %s25_s16  ;;  %s65_s20 = int_to_ptr.hbm [resolvable:$true] %s64_s20 }
   0xa   :  { %31 = dma.hbm_to_vmem [thread:$0]  %s24_s12, 2048, %s26_s16, [#allocation3], %s765_s13, %s765_s13, %s766_s14  }
   0xb   :  { %s768_s21 = smov [#allocation7]   ;;  %s769_s23 = smov [#allocation8]  }
   0xc   :  { %s51_s22 = sshll.u32 %s768_s21, 4  ;;  %s66_s2 = sshll.u32 %s769_s23, 4  ;;  %s52_s22 = int_to_ptr.vmem [resolvable:$true] %s51_s22  ;;  %s67_s2 = int_to_ptr.vmem [resolvable:$true] %s66_s2 }
   0xd   :  { %57 = dma.hbm_to_vmem [thread:$0]  %s50_s1, 2048, %s52_s22, [#allocation6], %s765_s13, %s765_s13, %s766_s14  }
   0xe   :  { %72 = dma.hbm_to_vmem [thread:$0]  %s65_s20, 2048, %s67_s2, [#allocation9], %s765_s13, %s765_s13, %s766_s14  }
   0xf   :  { %754 = dma.done.wait [#allocation3], 2048  }
  0x10   :  { %755 = vsyncadd [#allocation3], 4294965248 }
  0x11   :  { %756 = dma.done.wait [#allocation6], 4096  }
  0x12   :  { %757 = vsyncadd [#allocation6], 4294963200 }
  0x13   :  { %758 = dma.done.wait [#allocation9], 2048  }
  0x14   :  { %759 = vsyncadd [#allocation9], 4294965248  ;;  %v122_v0 = vld [vmem:[#allocation5 + $0x78] sm:$0xff]  ;;  %v121_v2 = vld [vmem:[#allocation5 + $0x70] sm:$0xff]  ;;  %s428_s27 = sshll.u32 %s1035_s6, 4  ;;  %s770_s28 = smov [#allocation10]   ;;  %s429_s27 = int_to_ptr.hbm [resolvable:$true] %s428_s27 }
  0x15   :  { %v844_v1 = vld [vmem:[#allocation8 + $0x78] sm:$0xff]  ;;  %123 = vmatpush.msra.mxu0 %v122_v0  ;;  %525 = vmatpush.msra.mxu3 %v122_v0  ;;  %v846_v3 = vld [vmem:[#allocation8 + $0x70] sm:$0xff]  ;;  %v120_v4 = vld [vmem:[#allocation5 + $0x68] sm:$0xff]  ;;  %s426_s29 = sshll.u32 %s770_s28, 4  ;;  %s771_s30 = smov [#allocation11]   ;;  %s427_s29 = int_to_ptr.vmem [resolvable:$true] %s426_s29 }
  0x16   :  { %341 = vmatpush.msra.mxu2 %v844_v1  ;;  %v849_v5 = vld [vmem:[#allocation7 + $0x78] sm:$0xff]  ;;  %v851_v6 = vld [vmem:[#allocation8 + $0x68] sm:$0xff]  ;;  %v853_v7 = vld [vmem:[#allocation7 + $0x70] sm:$0xff]  ;;  %s439_s9 = sshll.u32 %s771_s30, 4  ;;  %s441_s11 = sshll.u32 %s1036_s7, 4  ;;  %s440_s9 = int_to_ptr.vmem [resolvable:$true] %s439_s9  ;;  %s442_s11 = int_to_ptr.hbm [resolvable:$true] %s441_s11 }
  0x17   :  { %124 = vmatpush.msra.mxu0 %v121_v2  ;;  %526 = vmatpush.msra.mxu3 %v121_v2  ;;  %v119_v8 = vld [vmem:[#allocation5 + $0x60] sm:$0xff]  ;;  %v859_v10 = vld [vmem:[#allocation7 + $0x68] sm:$0xff]  ;;  %v118_v11 = vld [vmem:[#allocation5 + $0x58] sm:$0xff]  ;;  %s772_s12 = smov [#allocation13]   ;;  %s454_s18 = sshll.u32 %s1037_s8, 4  ;;  %s455_s18 = int_to_ptr.hbm [resolvable:$true] %s454_s18 }
  0x18   :  { %342 = vmatpush.msra.mxu2 %v846_v3  ;;  %240 = vmatpush.msra.mxu1 %v849_v5  ;;  %v857_v9 = vld [vmem:[#allocation8 + $0x60] sm:$0xff]  ;;  %v863_v12 = vld [vmem:[#allocation8 + $0x58] sm:$0xff]  ;;  %v117_v14 = vld [vmem:[#allocation5 + $0x50] sm:$0xff]  ;;  %s452_s15 = sshll.u32 %s772_s12, 4  ;;  %s773_s1 = smov 64   ;;  %s453_s15 = int_to_ptr.vmem [resolvable:$true] %s452_s15 }
  0x19   :  { %125 = vmatpush.msra.mxu0 %v120_v4  ;;  %527 = vmatpush.msra.mxu3 %v120_v4  ;;  %v865_v13 = vld [vmem:[#allocation7 + $0x60] sm:$0xff]  ;;  %v869_v15 = vld [vmem:[#allocation8 + $0x50] sm:$0xff]  ;;  %v871_v16 = vld [vmem:[#allocation7 + $0x58] sm:$0xff]  ;;  %s774_s0 = smov 4  }
  0x1a   :  { %343 = vmatpush.msra.mxu2 %v851_v6  ;;  %241 = vmatpush.msra.mxu1 %v853_v7  ;;  %v116_v17 = vld [vmem:[#allocation5 + $0x48] sm:$0xff]  ;;  %v877_v19 = vld [vmem:[#allocation7 + $0x50] sm:$0xff]  ;;  %v115_v20 = vld [vmem:[#allocation5 + $0x40] sm:$0xff] }
  0x1b   :  { %126 = vmatpush.msra.mxu0 %v119_v8  ;;  %528 = vmatpush.msra.mxu3 %v119_v8  ;;  %v875_v18 = vld [vmem:[#allocation8 + $0x48] sm:$0xff]  ;;  %v881_v21 = vld [vmem:[#allocation8 + $0x40] sm:$0xff]  ;;  %v114_v23 = vld [vmem:[#allocation5 + $0x38] sm:$0xff] }
  0x1c   :  { %344 = vmatpush.msra.mxu2 %v857_v9  ;;  %242 = vmatpush.msra.mxu1 %v859_v10  ;;  %v883_v22 = vld [vmem:[#allocation7 + $0x48] sm:$0xff]  ;;  %v887_v24 = vld [vmem:[#allocation8 + $0x38] sm:$0xff]  ;;  %v889_v25 = vld [vmem:[#allocation7 + $0x40] sm:$0xff] }
  0x1d   :  { %127 = vmatpush.msra.mxu0 %v118_v11  ;;  %529 = vmatpush.msra.mxu3 %v118_v11  ;;  %v113_v26 = vld [vmem:[#allocation5 + $0x30] sm:$0xff]  ;;  %v895_v28 = vld [vmem:[#allocation7 + $0x38] sm:$0xff]  ;;  %v112_v29 = vld [vmem:[#allocation5 + $0x28] sm:$0xff] }
  0x1e   :  { %345 = vmatpush.msra.mxu2 %v863_v12  ;;  %243 = vmatpush.msra.mxu1 %v865_v13  ;;  %v893_v27 = vld [vmem:[#allocation8 + $0x30] sm:$0xff]  ;;  %v899_v30 = vld [vmem:[#allocation8 + $0x28] sm:$0xff]  ;;  %v111_v32 = vld [vmem:[#allocation5 + $0x20] sm:$0xff] }
  0x1f   :  { %128 = vmatpush.msra.mxu0 %v117_v14  ;;  %530 = vmatpush.msra.mxu3 %v117_v14  ;;  %v901_v31 = vld [vmem:[#allocation7 + $0x30] sm:$0xff]  ;;  %v905_v33 = vld [vmem:[#allocation8 + $0x20] sm:$0xff]  ;;  %v907_v34 = vld [vmem:[#allocation7 + $0x28] sm:$0xff] }
  0x20   :  { %346 = vmatpush.msra.mxu2 %v869_v15  ;;  %244 = vmatpush.msra.mxu1 %v871_v16  ;;  %v110_v35 = vld [vmem:[#allocation5 + $0x18] sm:$0xff]  ;;  %v224_v37 = vld [vmem:[#allocation7 + $0x20] sm:$0xff]  ;;  %v109_v38 = vld [vmem:[#allocation5 + $0x10] sm:$0xff] }
  0x21   :  { %129 = vmatpush.msra.mxu0 %v116_v17  ;;  %531 = vmatpush.msra.mxu3 %v116_v17  ;;  %v911_v36 = vld [vmem:[#allocation8 + $0x18] sm:$0xff]  ;;  %v915_v39 = vld [vmem:[#allocation8 + $0x10] sm:$0xff]  ;;  %v108_v41 = vld [vmem:[#allocation5 + $0x8] sm:$0xff] }
  0x22   :  { %347 = vmatpush.msra.mxu2 %v875_v18  ;;  %245 = vmatpush.msra.mxu1 %v877_v19  ;;  %v223_v40 = vld [vmem:[#allocation7 + $0x18] sm:$0xff]  ;;  %v918_v42 = vld [vmem:[#allocation8 + $0x8] sm:$0xff]  ;;  %v222_v43 = vld [vmem:[#allocation7 + $0x10] sm:$0xff] }
  0x23   :  { %130 = vmatpush.msra.mxu0 %v115_v20  ;;  %532 = vmatpush.msra.mxu3 %v115_v20  ;;  %v107_v44 = vld [vmem:[#allocation5] sm:$0xff]  ;;  %v221_v48 = vld [vmem:[#allocation7 + $0x8] sm:$0xff]  ;;  %v93_v52 = vld [vmem:[#allocation2 + $0x10] sm:$0xff] }
  0x24   :  { %348 = vmatpush.msra.mxu2 %v881_v21  ;;  %246 = vmatpush.msra.mxu1 %v883_v22  ;;  %v921_v45 = vld [vmem:[#allocation8] sm:$0xff]  ;;  %v92_v50 = vld [vmem:[#allocation2 + $0x8] sm:$0xff]  ;;  %v938_v53 = vld [vmem:[#allocation2 + $0x70] sm:$0xff] }
  0x25   :  { %131 = vmatpush.msra.mxu0 %v114_v23  ;;  %533 = vmatpush.msra.mxu3 %v114_v23  ;;  %v91_v46 = vld [vmem:[#allocation2] sm:$0xff]  ;;  %v931_v51 = vld [vmem:[#allocation2 + $0x68] sm:$0xff]  ;;  %v94_v54 = vld [vmem:[#allocation2 + $0x18] sm:$0xff] }
  0x26   :  { %349 = vmatpush.msra.mxu2 %v887_v24  ;;  %247 = vmatpush.msra.mxu1 %v889_v25  ;;  %v924_v47 = vld [vmem:[#allocation2 + $0x60] sm:$0xff]  ;;  %v945_v55 = vld [vmem:[#allocation2 + $0x78] sm:$0xff]  ;;  %v96_v57 = vld [vmem:[#allocation2 + $0x28] sm:$0xff] }
  0x27   :  { %132 = vmatpush.msra.mxu0 %v113_v26  ;;  %534 = vmatpush.msra.mxu3 %v113_v26  ;;  %v220_v49 = vld [vmem:[#allocation7] sm:$0xff]  ;;  %v97_v58 = vld [vmem:[#allocation2 + $0x30] sm:$0xff]  ;;  %v98_v59 = vld [vmem:[#allocation2 + $0x38] sm:$0xff] }
  0x28   :  { %350 = vmatpush.msra.mxu2 %v893_v27  ;;  %248 = vmatpush.msra.mxu1 %v895_v28  ;;  %v95_v56 = vld [vmem:[#allocation2 + $0x20] sm:$0xff]  ;;  %v100_v61 = vld [vmem:[#allocation2 + $0x48] sm:$0xff]  ;;  %v101_v62 = vld [vmem:[#allocation2 + $0x50] sm:$0xff] }
  0x29   :  { %133 = vmatpush.msra.mxu0 %v112_v29  ;;  %535 = vmatpush.msra.mxu3 %v112_v29  ;;  %v99_v60 = vld [vmem:[#allocation2 + $0x40] sm:$0xff]  ;;  %v102_v63 = vld [vmem:[#allocation2 + $0x58] sm:$0xff] }
  0x2a   :  { %351 = vmatpush.msra.mxu2 %v899_v30  ;;  %249 = vmatpush.msra.mxu1 %v901_v31  ;;  %v980_v2 = vld [vmem:[%s1034_s5] ss:$0 sm:$0xff] }
  0x2b   :  { %134 = vmatpush.msra.mxu0 %v111_v32  ;;  %536 = vmatpush.msra.mxu3 %v111_v32 }
  0x2c   :  { %352 = vmatpush.msra.mxu2 %v905_v33  ;;  %250 = vmatpush.msra.mxu1 %v907_v34 }
  0x2d   :  { %135 = vmatpush.msra.mxu0 %v110_v35  ;;  %537 = vmatpush.msra.mxu3 %v110_v35 }
  0x2e   :  { %353 = vmatpush.msra.mxu2 %v911_v36  ;;  %251 = vmatpush.msra.mxu1 %v224_v37 }
  0x2f   :  { %136 = vmatpush.msra.mxu0 %v109_v38  ;;  %538 = vmatpush.msra.mxu3 %v109_v38 }
  0x30   :  { %354 = vmatpush.msra.mxu2 %v915_v39  ;;  %252 = vmatpush.msra.mxu1 %v223_v40 }
  0x31   :  { %137 = vmatpush.msra.mxu0 %v108_v41  ;;  %539 = vmatpush.msra.mxu3 %v108_v41 }
  0x32   :  { %355 = vmatpush.msra.mxu2 %v918_v42  ;;  %253 = vmatpush.msra.mxu1 %v222_v43 }
  0x33   :  { %138 = vmatpush.msra.mxu0 %v107_v44  ;;  %540 = vmatpush.msra.mxu3 %v107_v44 }
  0x34   :  { %356 = vmatpush.msra.mxu2 %v921_v45  ;;  %139 = vmatmul.f32.vlgmr.msra.gmra.mxu0 %v91_v46 }
  0x35   :  { %175 = vmatmul.f32.vlgmr.msra.gmra.mxu3 %v924_v47  ;;  %357 = vmatmul.f32.vlgmr.msra.gmra.mxu2 %v91_v46 }
  0x36   :  { %541 = vmatpush.msrb.mxu3 %v849_v5  ;;  %254 = vmatpush.msra.mxu1 %v221_v48 }
  0x38   :  { %542 = vmatpush.msrb.mxu3 %v853_v7  ;;  %255 = vmatpush.msra.mxu1 %v220_v49 }
  0x39   :  { %256 = vmatmul.f32.vlgmr.msra.gmra.mxu1 %v91_v46 }
  0x3a   :  { %543 = vmatpush.msrb.mxu3 %v859_v10 }
  0x3c   :  { %544 = vmatpush.msrb.mxu3 %v865_v13  ;;  %142 = vmatmul.f32.gmra.mxu0 %v92_v50 }
  0x3d   :  { %178 = vmatmul.f32.gmra.mxu3 %v931_v51  ;;  %360 = vmatmul.f32.gmra.mxu2 %v92_v50 }
  0x3e   :  { %545 = vmatpush.msrb.mxu3 %v871_v16 }
  0x40   :  { %546 = vmatpush.msrb.mxu3 %v877_v19 }
  0x41   :  { %259 = vmatmul.f32.gmra.mxu1 %v92_v50 }
  0x42   :  { %547 = vmatpush.msrb.mxu3 %v883_v22 }
  0x44   :  { %548 = vmatpush.msrb.mxu3 %v889_v25  ;;  %145 = vmatmul.f32.gmra.mxu0 %v93_v52 }
  0x45   :  { %181 = vmatmul.f32.gmra.mxu3 %v938_v53  ;;  %363 = vmatmul.f32.gmra.mxu2 %v93_v52 }
  0x46   :  { %549 = vmatpush.msrb.mxu3 %v895_v28 }
  0x48   :  { %550 = vmatpush.msrb.mxu3 %v901_v31 }
  0x49   :  { %262 = vmatmul.f32.gmra.mxu1 %v93_v52 }
  0x4a   :  { %551 = vmatpush.msrb.mxu3 %v907_v34 }
  0x4c   :  { %552 = vmatpush.msrb.mxu3 %v224_v37  ;;  %148 = vmatmul.f32.gmra.mxu0 %v94_v54 }
  0x4d   :  { %184 = vmatmul.f32.gmra.mxu3 %v945_v55  ;;  %366 = vmatmul.f32.gmra.mxu2 %v94_v54 }
  0x4e   :  { %553 = vmatpush.msrb.mxu3 %v223_v40 }
  0x50   :  { %554 = vmatpush.msrb.mxu3 %v222_v43 }
  0x51   :  { %265 = vmatmul.f32.gmra.mxu1 %v94_v54 }
  0x52   :  { %555 = vmatpush.msrb.mxu3 %v221_v48 }
  0x54   :  { %556 = vmatpush.msrb.mxu3 %v220_v49  ;;  %151 = vmatmul.f32.gmra.mxu0 %v95_v56 }
  0x55   :  { %292 = vmatmul.f32.vlgmr.msrb.gmra.mxu3 %v924_v47  ;;  %369 = vmatmul.f32.gmra.mxu2 %v95_v56 }
  0x56   :  { %557 = vmatpush.msra.mxu3 %v844_v1  ;;  %v975_v1 = vld [vmem:[%s1032_s3] ss:$0 sm:$0xff] }
  0x58   :  { %558 = vmatpush.msra.mxu3 %v846_v3 }
  0x59   :  { %268 = vmatmul.f32.gmra.mxu1 %v95_v56 }
  0x5a   :  { %559 = vmatpush.msra.mxu3 %v851_v6 }
  0x5c   :  { %560 = vmatpush.msra.mxu3 %v857_v9  ;;  %154 = vmatmul.f32.gmra.mxu0 %v96_v57 }
  0x5d   :  { %295 = vmatmul.f32.gmra.mxu3 %v931_v51  ;;  %372 = vmatmul.f32.gmra.mxu2 %v96_v57 }
  0x5e   :  { %561 = vmatpush.msra.mxu3 %v863_v12 }
  0x60   :  { %562 = vmatpush.msra.mxu3 %v869_v15 }
  0x61   :  { %271 = vmatmul.f32.gmra.mxu1 %v96_v57 }
  0x62   :  { %563 = vmatpush.msra.mxu3 %v875_v18 }
  0x64   :  { %564 = vmatpush.msra.mxu3 %v881_v21  ;;  %157 = vmatmul.f32.gmra.mxu0 %v97_v58 }
  0x65   :  { %298 = vmatmul.f32.gmra.mxu3 %v938_v53  ;;  %375 = vmatmul.f32.gmra.mxu2 %v97_v58 }
  0x66   :  { %565 = vmatpush.msra.mxu3 %v887_v24 }
  0x68   :  { %566 = vmatpush.msra.mxu3 %v893_v27 }
  0x69   :  { %274 = vmatmul.f32.gmra.mxu1 %v97_v58 }
  0x6a   :  { %567 = vmatpush.msra.mxu3 %v899_v30 }
  0x6c   :  { %568 = vmatpush.msra.mxu3 %v905_v33  ;;  %160 = vmatmul.f32.gmra.mxu0 %v98_v59 }
  0x6d   :  { %301 = vmatmul.f32.gmra.mxu3 %v945_v55  ;;  %378 = vmatmul.f32.gmra.mxu2 %v98_v59 }
  0x6e   :  { %569 = vmatpush.msra.mxu3 %v911_v36 }
  0x70   :  { %570 = vmatpush.msra.mxu3 %v915_v39 }
  0x71   :  { %277 = vmatmul.f32.gmra.mxu1 %v98_v59 }
  0x72   :  { %571 = vmatpush.msra.mxu3 %v918_v42 }
  0x74   :  { %572 = vmatpush.msra.mxu3 %v921_v45  ;;  %163 = vmatmul.f32.gmra.mxu0 %v99_v60 }
  0x75   :  { %381 = vmatmul.f32.gmra.mxu2 %v99_v60  ;;  %393 = vmatmul.f32.vlgmr.msra.gmra.mxu3 %v924_v47 }
  0x79   :  { %280 = vmatmul.f32.gmra.mxu1 %v99_v60 }
  0x7c   :  { %166 = vmatmul.f32.gmra.mxu0 %v100_v61 }
  0x7d   :  { %384 = vmatmul.f32.gmra.mxu2 %v100_v61  ;;  %396 = vmatmul.f32.gmra.mxu3 %v931_v51 }
  0x81   :  { %283 = vmatmul.f32.gmra.mxu1 %v100_v61 }
  0x84   :  { %169 = vmatmul.f32.gmra.mxu0 %v101_v62 }
  0x85   :  { %387 = vmatmul.f32.gmra.mxu2 %v101_v62  ;;  %399 = vmatmul.f32.gmra.mxu3 %v938_v53 }
  0x89   :  { %286 = vmatmul.f32.gmra.mxu1 %v101_v62 }
  0x8c   :  { %172 = vmatmul.f32.gmra.mxu0 %v102_v63 }
  0x8d   :  { %390 = vmatmul.f32.gmra.mxu2 %v102_v63  ;;  %402 = vmatmul.f32.gmra.mxu3 %v945_v55 }
  0x91   :  { %289 = vmatmul.f32.gmra.mxu1 %v102_v63 }
  0xb1   :  { %v140_v0 = vpop.f32.mrf.mxu0 }
  0xb6   :  { %v257_v3 = vpop.f32.mrf.mxu1 }
  0xb7   :  { %v258_v4 = vadd.f32 %v975_v1, %v257_v3 }
  0xb8   :  { %v176_v5 = vpop.f32.mrf.mxu3  ;;  %v358_v6 = vpop.f32.mrf.mxu2 }
  0xb9   :  { %305 = vst [vmem:[#allocation11] sm:$0xff] %v258_v4  ;;  %v359_v7 = vadd.f32 %v980_v2, %v358_v6  ;;  %v143_v8 = vpop.f32.mrf.mxu0 }
  0xba   :  { %v481_v9 = vpack.c.bf16 %v143_v8, %v140_v0 }
  0xbb   :  { %406 = vst [vmem:[#allocation13] sm:$0xff] %v359_v7 }
  0xbc   :  { %482 = vst [vmem:[#allocation10] sm:$0xff] %v481_v9  }
  0xbe   :  { %v260_v10 = vpop.f32.mrf.mxu1 }
  0xbf   :  { %v261_v11 = vadd.f32 %v975_v1, %v260_v10 }
  0xc0   :  { %v179_v12 = vpop.f32.mrf.mxu3  ;;  %v361_v13 = vpop.f32.mrf.mxu2 }
  0xc1   :  { %306 = vst [vmem:[#allocation11 + $0x8] sm:$0xff] %v261_v11  ;;  %v511_v14 = vpack.c.bf16 %v179_v12, %v176_v5  ;;  %v362_v15 = vadd.f32 %v980_v2, %v361_v13  ;;  %v146_v16 = vpop.f32.mrf.mxu0 }
  0xc3   :  { %523 = vst [vmem:[#allocation10 + $0x30] sm:$0xff] %v511_v14  }
  0xc4   :  { %407 = vst [vmem:[#allocation13 + $0x8] sm:$0xff] %v362_v15 }
  0xc6   :  { %v263_v17 = vpop.f32.mrf.mxu1 }
  0xc7   :  { %v264_v18 = vadd.f32 %v975_v1, %v263_v17 }
  0xc8   :  { %v182_v19 = vpop.f32.mrf.mxu3  ;;  %v364_v20 = vpop.f32.mrf.mxu2 }
  0xc9   :  { %307 = vst [vmem:[#allocation11 + $0x10] sm:$0xff] %v264_v18  ;;  %v365_v21 = vadd.f32 %v980_v2, %v364_v20  ;;  %v149_v22 = vpop.f32.mrf.mxu0 }
  0xca   :  { %v486_v23 = vpack.c.bf16 %v149_v22, %v146_v16 }
  0xcb   :  { %408 = vst [vmem:[#allocation13 + $0x10] sm:$0xff] %v365_v21 }
  0xcc   :  { %518 = vst [vmem:[#allocation10 + $0x8] sm:$0xff] %v486_v23  }
  0xce   :  { %v266_v24 = vpop.f32.mrf.mxu1 }
  0xcf   :  { %v267_v25 = vadd.f32 %v975_v1, %v266_v24 }
  0xd0   :  { %v185_v26 = vpop.f32.mrf.mxu3  ;;  %v367_v27 = vpop.f32.mrf.mxu2 }
  0xd1   :  { %308 = vst [vmem:[#allocation11 + $0x18] sm:$0xff] %v267_v25  ;;  %v516_v28 = vpack.c.bf16 %v185_v26, %v182_v19  ;;  %v368_v29 = vadd.f32 %v980_v2, %v367_v27  ;;  %v152_v30 = vpop.f32.mrf.mxu0 }
  0xd3   :  { %524 = vst [vmem:[#allocation10 + $0x38] sm:$0xff] %v516_v28  }
  0xd4   :  { %409 = vst [vmem:[#allocation13 + $0x18] sm:$0xff] %v368_v29 }
  0xd6   :  { %v269_v31 = vpop.f32.mrf.mxu1 }
  0xd7   :  { %v270_v32 = vadd.f32 %v975_v1, %v269_v31 }
  0xd8   :  { %v293_v33 = vpop.f32.mrf.mxu3  ;;  %v370_v34 = vpop.f32.mrf.mxu2 }
  0xd9   :  { %309 = vst [vmem:[#allocation11 + $0x20] sm:$0xff] %v270_v32  ;;  %v294_v35 = vadd.f32 %v975_v1, %v293_v33  ;;  %v371_v36 = vadd.f32 %v980_v2, %v370_v34  ;;  %v155_v37 = vpop.f32.mrf.mxu0 }
  0xda   :  { %v491_v38 = vpack.c.bf16 %v155_v37, %v152_v30 }
  0xdb   :  { %317 = vst [vmem:[#allocation11 + $0x60] sm:$0xff] %v294_v35 }
  0xdc   :  { %410 = vst [vmem:[#allocation13 + $0x20] sm:$0xff] %v371_v36 }
  0xdd   :  { %519 = vst [vmem:[#allocation10 + $0x10] sm:$0xff] %v491_v38  }
  0xde   :  { %v272_v39 = vpop.f32.mrf.mxu1 }
  0xdf   :  { %v273_v40 = vadd.f32 %v975_v1, %v272_v39 }
  0xe0   :  { %v296_v41 = vpop.f32.mrf.mxu3  ;;  %v373_v42 = vpop.f32.mrf.mxu2 }
  0xe1   :  { %310 = vst [vmem:[#allocation11 + $0x28] sm:$0xff] %v273_v40  ;;  %v297_v43 = vadd.f32 %v975_v1, %v296_v41  ;;  %v374_v44 = vadd.f32 %v980_v2, %v373_v42  ;;  %v158_v45 = vpop.f32.mrf.mxu0 }
  0xe3   :  { %318 = vst [vmem:[#allocation11 + $0x68] sm:$0xff] %v297_v43 }
  0xe4   :  { %411 = vst [vmem:[#allocation13 + $0x28] sm:$0xff] %v374_v44 }
  0xe6   :  { %v275_v46 = vpop.f32.mrf.mxu1 }
  0xe7   :  { %v276_v47 = vadd.f32 %v975_v1, %v275_v46 }
  0xe8   :  { %v299_v48 = vpop.f32.mrf.mxu3  ;;  %v376_v49 = vpop.f32.mrf.mxu2 }
  0xe9   :  { %311 = vst [vmem:[#allocation11 + $0x30] sm:$0xff] %v276_v47  ;;  %v300_v50 = vadd.f32 %v975_v1, %v299_v48  ;;  %v377_v51 = vadd.f32 %v980_v2, %v376_v49  ;;  %v161_v52 = vpop.f32.mrf.mxu0 }
  0xea   :  { %v496_v53 = vpack.c.bf16 %v161_v52, %v158_v45 }
  0xeb   :  { %319 = vst [vmem:[#allocation11 + $0x70] sm:$0xff] %v300_v50 }
  0xec   :  { %412 = vst [vmem:[#allocation13 + $0x30] sm:$0xff] %v377_v51 }
  0xed   :  { %520 = vst [vmem:[#allocation10 + $0x18] sm:$0xff] %v496_v53  }
  0xee   :  { %v278_v54 = vpop.f32.mrf.mxu1 }
  0xef   :  { %v279_v55 = vadd.f32 %v975_v1, %v278_v54 }
  0xf0   :  { %v302_v56 = vpop.f32.mrf.mxu3  ;;  %v379_v57 = vpop.f32.mrf.mxu2 }
  0xf1   :  { %312 = vst [vmem:[#allocation11 + $0x38] sm:$0xff] %v279_v55  ;;  %v303_v58 = vadd.f32 %v975_v1, %v302_v56  ;;  %v380_v59 = vadd.f32 %v980_v2, %v379_v57  ;;  %v164_v60 = vpop.f32.mrf.mxu0 }
  0xf3   :  { %320 = vst [vmem:[#allocation11 + $0x78] sm:$0xff] %v303_v58 }
  0xf4   :  { %413 = vst [vmem:[#allocation13 + $0x38] sm:$0xff] %v380_v59 }
  0xf6   :  { %v281_v61 = vpop.f32.mrf.mxu1 }
  0xf7   :  { %v282_v62 = vadd.f32 %v975_v1, %v281_v61 }
  0xf8   :  { %v382_v63 = vpop.f32.mrf.mxu2  ;;  %v394_v0 = vpop.f32.mrf.mxu3 }
  0xf9   :  { %313 = vst [vmem:[#allocation11 + $0x40] sm:$0xff] %v282_v62  ;;  %v383_v3 = vadd.f32 %v980_v2, %v382_v63  ;;  %v395_v4 = vadd.f32 %v980_v2, %v394_v0  ;;  %v167_v5 = vpop.f32.mrf.mxu0 }
  0xfa   :  { %v501_v6 = vpack.c.bf16 %v167_v5, %v164_v60 }
  0xfb   :  { %414 = vst [vmem:[#allocation13 + $0x40] sm:$0xff] %v383_v3 }
  0xfc   :  { %418 = vst [vmem:[#allocation13 + $0x60] sm:$0xff] %v395_v4 }
  0xfd   :  { %521 = vst [vmem:[#allocation10 + $0x20] sm:$0xff] %v501_v6  }
  0xfe   :  { %v284_v7 = vpop.f32.mrf.mxu1 }
  0xff   :  { %v285_v8 = vadd.f32 %v975_v1, %v284_v7 }
 0x100   :  { %v385_v9 = vpop.f32.mrf.mxu2  ;;  %v397_v10 = vpop.f32.mrf.mxu3 }
 0x101   :  { %314 = vst [vmem:[#allocation11 + $0x48] sm:$0xff] %v285_v8  ;;  %v386_v11 = vadd.f32 %v980_v2, %v385_v9  ;;  %v398_v12 = vadd.f32 %v980_v2, %v397_v10  ;;  %v170_v13 = vpop.f32.mrf.mxu0 }
 0x103   :  { %415 = vst [vmem:[#allocation13 + $0x48] sm:$0xff] %v386_v11 }
 0x104   :  { %419 = vst [vmem:[#allocation13 + $0x68] sm:$0xff] %v398_v12 }
 0x106   :  { %v287_v14 = vpop.f32.mrf.mxu1 }
 0x107   :  { %v288_v15 = vadd.f32 %v975_v1, %v287_v14 }
 0x108   :  { %v388_v16 = vpop.f32.mrf.mxu2  ;;  %v400_v17 = vpop.f32.mrf.mxu3 }
 0x109   :  { %315 = vst [vmem:[#allocation11 + $0x50] sm:$0xff] %v288_v15  ;;  %v389_v18 = vadd.f32 %v980_v2, %v388_v16  ;;  %v401_v19 = vadd.f32 %v980_v2, %v400_v17  ;;  %v173_v20 = vpop.f32.mrf.mxu0 }
 0x10a   :  { %v506_v21 = vpack.c.bf16 %v173_v20, %v170_v13 }
 0x10b   :  { %416 = vst [vmem:[#allocation13 + $0x50] sm:$0xff] %v389_v18 }
 0x10c   :  { %420 = vst [vmem:[#allocation13 + $0x70] sm:$0xff] %v401_v19 }
 0x10d   :  { %522 = vst [vmem:[#allocation10 + $0x28] sm:$0xff] %v506_v21  }
 0x10e   :  { %v290_v22 = vpop.f32.mrf.mxu1  ;;  %434 = dma.vmem_to_hbm [thread:$0]  %s427_s29, 1024, %s429_s27, [#allocation4], %s773_s1, %s773_s1, %s774_s0  }
 0x10f   :  { %v291_v23 = vadd.f32 %v975_v1, %v290_v22 }
 0x110   :  { %v391_v24 = vpop.f32.mrf.mxu2  ;;  %v403_v25 = vpop.f32.mrf.mxu3 }
 0x111   :  { %316 = vst [vmem:[#allocation11 + $0x58] sm:$0xff] %v291_v23  ;;  %v392_v26 = vadd.f32 %v980_v2, %v391_v24  ;;  %v404_v27 = vadd.f32 %v980_v2, %v403_v25 }
 0x112   :  { %447 = dma.vmem_to_hbm [thread:$0]  %s440_s9, 2048, %s442_s11, [#allocation12], %s765_s13, %s765_s13, %s766_s14  }
 0x113   :  { %417 = vst [vmem:[#allocation13 + $0x58] sm:$0xff] %v392_v26 }
 0x114   :  { %421 = vst [vmem:[#allocation13 + $0x78] sm:$0xff] %v404_v27 }
 0x115   :  { %460 = dma.vmem_to_hbm [thread:$0]  %s453_s15, 2048, %s455_s18, [#allocation12], %s765_s13, %s765_s13, %s766_s14  }
 0x116   :  { %760 = dma.done.wait [#allocation4], 1024  }
 0x117   :  { %761 = vsyncadd [#allocation4], 4294966272 }
 0x118   :  { %762 = dma.done.wait [#allocation12], 4096  }
 0x119   :  { %763 = vsyncadd [#allocation12], 4294963200 }
 0x11a   :  { %473 = vsyncpa [#allocation3], 1 }
 0x11b   :  { %474 = vsyncpa [#allocation6], 1 }
 0x11c   :  { %475 = vsyncpa [#allocation9], 1 }
 0x11d   :  { %476 = vsyncpa [#allocation4], 1 }
 0x11e   :  { %477 = vsyncpa [#allocation12], 1 }

</bundles_post_ra>
